<compile_context>
chip_gen: v7x
topology: tpu7x:2x2x1
jax: 0.10.0
libtpu: 0.0.40
codegen_flags: <defaults>
</compile_context>

<pallas_src>
import jax
import jax.numpy as jnp
from jax.experimental import pallas as pl
from jax.experimental.pallas import tpu as pltpu

BN_EPS = 1e-5
NEG_SLOPE = 0.1

# true sizes
F_IN, H1, H2, F_OUT = 4, 64, 32, 3

# packed / padded sizes (transposed layout: features on sublanes)
OUT_ROWS = 8                 # output feature rows padded 3 -> 8 (sublane multiple)
R2_OFF = H1                  # 64   start row of W2^T / b2 in the packed arrays
R3_OFF = H1 + H2             # 96   start row of W3^T / b3
ROWS = R3_OFF + OUT_ROWS     # 104  total packed rows (multiple of 8)
W_LANES = 64                 # lane width of the packed weight array (= max K)

MAX_TILE_B = 2048            # batch-lane tile cap (VMEM use ~1.2 MiB at 2048)


def _leaky_relu(x):
    return jnp.maximum(x, NEG_SLOPE * x)


def _round_up(x, m):
    return (x + m - 1) // m * m


def iris_mlp_kernel(xt_ref, w_ref, b_ref, ot_ref):
    """Transposed MLP: features on sublanes, batch on lanes.

    xt_ref : (4, tile_b)      x^T batch tile
    w_ref  : (104, 64)        packed [W1f^T | W2f^T | W3^T] (BN folded)
    b_ref  : (104, 1)         packed [b1f | b2f | b3] column
    ot_ref : (8, tile_b)      out^T batch tile (rows 3..7 are zero padding)
    """
    # --- fc1 (+ folded bn1) -> leaky_relu   (dropout = identity in eval) ---
    h = jnp.dot(w_ref[0:H1, 0:F_IN], xt_ref[...],
                preferred_element_type=jnp.float32)            # (64, tile_b)
    h = _leaky_relu(h + b_ref[0:H1, :])
    # --- fc2 (+ folded bn2) -> leaky_relu ---
    h = jnp.dot(w_ref[R2_OFF:R3_OFF, 0:H1], h,
                preferred_element_type=jnp.float32)            # (32, tile_b)
    h = _leaky_relu(h + b_ref[R2_OFF:R3_OFF, :])
    # --- fc3 ---
    h = jnp.dot(w_ref[R3_OFF:ROWS, 0:H2], h,
                preferred_element_type=jnp.float32)            # (8, tile_b)
    ot_ref[...] = h + b_ref[R3_OFF:ROWS, :]


def fold_and_pack(params):
    """Fold eval-mode BatchNorm into the Linears, transpose, and pack.

    Call once (outside the hot path).  Returns two arrays:
      w : (104, 64)  rows [0:64]=W1f^T (lanes 0:4), [64:96]=W2f^T (lanes 0:64),
                     [96:104]=W3^T (lanes 0:32, only 3 real rows)
      b : (104, 1)   matching bias column
    Padded rows/lanes are zero, so padded output rows stay exactly zero.
    """
    s1 = params["g1"] * jax.lax.rsqrt(params["v1"] + BN_EPS)
    w1f = params["w1"] * s1[None, :]                       # (4, 64)
    b1f = (params["b1"] - params["m1"]) * s1 + params["be1"]

    s2 = params["g2"] * jax.lax.rsqrt(params["v2"] + BN_EPS)
    w2f = params["w2"] * s2[None, :]                       # (64, 32)
    b2f = (params["b2"] - params["m2"]) * s2 + params["be2"]

    w = jnp.zeros((ROWS, W_LANES), jnp.float32)
    w = w.at[0:H1, 0:F_IN].set(w1f.T)                      # (64, 4)
    w = w.at[R2_OFF:R3_OFF, 0:H1].set(w2f.T)               # (32, 64)
    w = w.at[R3_OFF:R3_OFF + F_OUT, 0:H2].set(params["w3"].T)  # (3, 32)

    b = jnp.zeros((ROWS, 1), jnp.float32)
    b = b.at[0:H1, 0].set(b1f)
    b = b.at[R2_OFF:R3_OFF, 0].set(b2f)
    b = b.at[R3_OFF:R3_OFF + F_OUT, 0].set(params["b3"])

    return {"w": w, "b": b}


def _pick_tile_b(batch):
    """Batch-lane tile: multiple of 128, >=2 grid steps past B=512 (v7x TCs)."""
    if batch <= 512:
        return _round_up(batch, 128)
    half = _round_up(-(-batch // 2), 128)
    return min(MAX_TILE_B, half)


@jax.jit
def iris_forward(x, packed):
    """x: (B, 4) float32, packed = fold_and_pack(params) -> (B, 3) float32."""
    batch = x.shape[0]
    tile_b = _pick_tile_b(batch)
    grid = (pl.cdiv(batch, tile_b),)

    xt = x.T                                   # (4, B): batch on lanes

    cost = pl.CostEstimate(
        flops=2 * batch * (F_IN * H1 + H1 * H2 + H2 * F_OUT),
        transcendentals=0,
        bytes_accessed=4 * (batch * (F_IN + OUT_ROWS) + ROWS * W_LANES + ROWS),
    )

    out_t = pl.pallas_call(
        iris_mlp_kernel,
        out_shape=jax.ShapeDtypeStruct((OUT_ROWS, batch), jnp.float32),
        grid=grid,
        in_specs=[
            pl.BlockSpec((F_IN, tile_b), lambda i: (0, i)),     # x^T batch tile
            pl.BlockSpec((ROWS, W_LANES), lambda i: (0, 0)),    # packed weights
            pl.BlockSpec((ROWS, 1), lambda i: (0, 0)),          # packed biases
        ],
        out_specs=pl.BlockSpec((OUT_ROWS, tile_b), lambda i: (0, i)),
        compiler_params=pltpu.CompilerParams(
            dimension_semantics=("parallel",)),
        cost_estimate=cost,
    )(xt, packed["w"], packed["b"])

    return out_t[:F_OUT, :].T                  # (B, 3)


def make_params(key):
    """Deterministic params mirroring IrisNN (kaiming linears, BN stats).

    BN running stats / affine params are randomized (as after training) so the
    BatchNorm fold is actually exercised numerically.  All keys are distinct.
    """
    ks = jax.random.split(key, 5)
    gain = (2.0 / (1.0 + NEG_SLOPE ** 2)) ** 0.5

    def kaiming(k, fan_in, fan_out):
        std = gain / (fan_in ** 0.5)
        return std * jax.random.normal(k, (fan_in, fan_out), jnp.float32)

    def bn(k, n):
        kg, kb, km, kv = jax.random.split(k, 4)
        return (1.0 + 0.1 * jax.random.normal(kg, (n,), jnp.float32),    # gamma
                0.1 * jax.random.normal(kb, (n,), jnp.float32),          # beta
                0.1 * jax.random.normal(km, (n,), jnp.float32),          # mean
                jnp.abs(jax.random.normal(kv, (n,), jnp.float32)) + 0.5)  # var

    g1, be1, m1, v1 = bn(ks[3], H1)
    g2, be2, m2, v2 = bn(ks[4], H2)
    return {
        "w1": kaiming(ks[0], F_IN, H1), "b1": jnp.zeros((H1,), jnp.float32),
        "g1": g1, "be1": be1, "m1": m1, "v1": v1,
        "w2": kaiming(ks[1], H1, H2), "b2": jnp.zeros((H2,), jnp.float32),
        "g2": g2, "be2": be2, "m2": m2, "v2": v2,
        "w3": kaiming(ks[2], H2, F_OUT), "b3": jnp.zeros((F_OUT,), jnp.float32),
    }


def reference_forward(x, p):
    """Pure-JAX eval-mode reference (unfolded BN) for correctness checking."""
    def bn(h, g, b, m, v):
        return (h - m) * jax.lax.rsqrt(v + BN_EPS) * g + b

    h = x @ p["w1"] + p["b1"]
    h = _leaky_relu(bn(h, p["g1"], p["be1"], p["m1"], p["v1"]))
    h = h @ p["w2"] + p["b2"]
    h = _leaky_relu(bn(h, p["g2"], p["be2"], p["m2"], p["v2"]))
    return h @ p["w3"] + p["b3"]


if __name__ == "__main__":
    key = jax.random.PRNGKey(0)
    kx1, kx2, kx3, kp = jax.random.split(key, 4)

    params = make_params(kp)
    packed = jax.tree_util.tree_map(jax.block_until_ready, fold_and_pack(params))

    # B=2: tiny Iris-scale batch, single ragged tile.
    # B=40: ragged tile, multiple-of-8 batch.
    # B=600: >512 so the grid has 2 steps (exercises the v7x two-step path
    #        and the ragged last tile).
    for kx, bsz in ((kx1, 2), (kx2, 40), (kx3, 600)):
        x = jax.random.normal(kx, (bsz, F_IN), jnp.float32)
        out = jax.block_until_ready(iris_forward(x, packed))
        ref = reference_forward(x, params)
        assert out.shape == (bsz, F_OUT), (bsz, out.shape)
        assert jnp.allclose(out, ref, atol=1e-4, rtol=1e-4), (bsz, out, ref)

    print("KERNEL_OK")
</pallas_src>

<mosaic_0001>
module attributes {stable_mosaic.version = 11 : i64} {
  func.func @iris_mlp_kernel(%arg0: i32, %arg1: memref<4x128xf32, #tpu.memory_space<vmem>>, %arg2: memref<104x64xf32, #tpu.memory_space<vmem>>, %arg3: memref<104x1xf32, #tpu.memory_space<vmem>>, %arg4: memref<8x128xf32, #tpu.memory_space<vmem>>) attributes {dimension_semantics = [#tpu.dimension_semantics<parallel>], iteration_bounds = array<i64: 1>, scalar_prefetch = 0 : i64, scratch_operands = 0 : i64, tpu.core_type = #tpu.core_type<tc>, window_params = [{transform_indices = @transform_0, window_bounds = array<i64: 4, 128>}, {pipeline_mode = #tpu.pipeline_mode<synchronous>, transform_indices = @transform_1, window_bounds = array<i64: 104, 64>}, {pipeline_mode = #tpu.pipeline_mode<synchronous>, transform_indices = @transform_2, window_bounds = array<i64: 104, 1>}, {transform_indices = @transform_3, window_bounds = array<i64: 8, 128>}]} {
    %c0 = arith.constant 0 : index
    %c0_0 = arith.constant 0 : index
    %0 = vector.load %arg2[%c0, %c0_0] : memref<104x64xf32, #tpu.memory_space<vmem>>, vector<64x4xf32>
    %c0_1 = arith.constant 0 : index
    %c0_2 = arith.constant 0 : index
    %1 = vector.load %arg1[%c0_1, %c0_2] : memref<4x128xf32, #tpu.memory_space<vmem>>, vector<4x128xf32>
    %cst = arith.constant dense<0.000000e+00> : vector<64x128xf32>
    %2 = tpu.matmul %0, %1, %cst {dimension_numbers = #tpu.dot_dimension_numbers<[1], [0], [0], [1], [0, 0, 1, 1], [], []>} : vector<64x4xf32>, vector<4x128xf32>, vector<64x128xf32> -> vector<64x128xf32>
    %c0_3 = arith.constant 0 : index
    %c0_4 = arith.constant 0 : index
    %3 = vector.load %arg3[%c0_3, %c0_4] : memref<104x1xf32, #tpu.memory_space<vmem>>, vector<64x1xf32>
    %4 = vector.broadcast %3 : vector<64x1xf32> to vector<64x128xf32>
    %5 = arith.addf %2, %4 : vector<64x128xf32>
    %cst_5 = arith.constant 1.000000e-01 : f32
    %6 = vector.broadcast %cst_5 : f32 to vector<64x128xf32>
    %7 = arith.mulf %6, %5 : vector<64x128xf32>
    %8 = arith.maximumf %5, %7 : vector<64x128xf32>
    %c64 = arith.constant 64 : index
    %c0_6 = arith.constant 0 : index
    %9 = vector.load %arg2[%c64, %c0_6] : memref<104x64xf32, #tpu.memory_space<vmem>>, vector<32x64xf32>
    %cst_7 = arith.constant dense<0.000000e+00> : vector<32x128xf32>
    %10 = tpu.matmul %9, %8, %cst_7 {dimension_numbers = #tpu.dot_dimension_numbers<[1], [0], [0], [1], [0, 0, 1, 1], [], []>} : vector<32x64xf32>, vector<64x128xf32>, vector<32x128xf32> -> vector<32x128xf32>
    %c64_8 = arith.constant 64 : index
    %c0_9 = arith.constant 0 : index
    %11 = vector.load %arg3[%c64_8, %c0_9] : memref<104x1xf32, #tpu.memory_space<vmem>>, vector<32x1xf32>
    %12 = vector.broadcast %11 : vector<32x1xf32> to vector<32x128xf32>
    %13 = arith.addf %10, %12 : vector<32x128xf32>
    %cst_10 = arith.constant 1.000000e-01 : f32
    %14 = vector.broadcast %cst_10 : f32 to vector<32x128xf32>
    %15 = arith.mulf %14, %13 : vector<32x128xf32>
    %16 = arith.maximumf %13, %15 : vector<32x128xf32>
    %c96 = arith.constant 96 : index
    %c0_11 = arith.constant 0 : index
    %17 = vector.load %arg2[%c96, %c0_11] : memref<104x64xf32, #tpu.memory_space<vmem>>, vector<8x32xf32>
    %cst_12 = arith.constant dense<0.000000e+00> : vector<8x128xf32>
    %18 = tpu.matmul %17, %16, %cst_12 {dimension_numbers = #tpu.dot_dimension_numbers<[1], [0], [0], [1], [0, 0, 1, 1], [], []>} : vector<8x32xf32>, vector<32x128xf32>, vector<8x128xf32> -> vector<8x128xf32>
    %c96_13 = arith.constant 96 : index
    %c0_14 = arith.constant 0 : index
    %19 = vector.load %arg3[%c96_13, %c0_14] : memref<104x1xf32, #tpu.memory_space<vmem>>, vector<8x1xf32>
    %20 = vector.broadcast %19 : vector<8x1xf32> to vector<8x128xf32>
    %21 = arith.addf %18, %20 : vector<8x128xf32>
    %c0_15 = arith.constant 0 : index
    %c0_16 = arith.constant 0 : index
    %22 = vector.load %arg4[%c0_15, %c0_16] : memref<8x128xf32, #tpu.memory_space<vmem>>, vector<8x128xf32>
    tpu.vector_store %arg4[%c0_15, %c0_16], %21 {strides = array<i32>} : memref<8x128xf32, #tpu.memory_space<vmem>>, vector<8x128xf32>,
    return
  }
  func.func @transform_0(%arg0: i32) -> (i32, i32) {
    %c0_i32 = arith.constant 0 : i32
    %c0_i32_0 = arith.constant 0 : i32
    return %c0_i32, %arg0 : i32, i32
  }
  func.func @transform_1(%arg0: i32) -> (i32, i32) {
    %c0_i32 = arith.constant 0 : i32
    %c0_i32_0 = arith.constant 0 : i32
    %c0_i32_1 = arith.constant 0 : i32
    return %c0_i32, %c0_i32_0 : i32, i32
  }
  func.func @transform_2(%arg0: i32) -> (i32, i32) {
    %c0_i32 = arith.constant 0 : i32
    %c0_i32_0 = arith.constant 0 : i32
    %c0_i32_1 = arith.constant 0 : i32
    return %c0_i32, %c0_i32_0 : i32, i32
  }
  func.func @transform_3(%arg0: i32) -> (i32, i32) {
    %c0_i32 = arith.constant 0 : i32
    %c0_i32_0 = arith.constant 0 : i32
    return %c0_i32, %arg0 : i32, i32
  }
}

</mosaic_0001>

<bundles_post_ra>
// kernel: iris_forward.1
= control target key start
LH: loop header
LB: loop body
LE: loop exit
PB: predicated region body
PF: predicated region fallthrough
CT: control target
= control target key end

     0   :  { %vm96_vm0 = vcmask 1043456   ;;  %vm71_vm1 = vcmask 31744   ;;  %v556_v3 = vmov 0   ;;  %vm249_vm2 = vcmask 523264   ;;  %s676_s0 = inlined_call_operand.vmem [shape: f32[4,2], index: 0, kind: input, shape index: {}]   ;;  %s677_s1 = inlined_call_operand.vmem [shape: f32[104,64], index: 1, kind: input, shape index: {}]   ;;  %s678_s2 = inlined_call_operand.vmem [shape: f32[104,1], index: 2, kind: input, shape index: {}]   ;;  %s679_s3 = inlined_call_operand.vmem [shape: f32[8,2], index: 3, kind: output, shape index: {}]  }
   0x1   :  { %v22_v0 = vld [vmem:[%s676_s0] sm:$0xf]  ;;  %v15_v2 = vld [vmem:[%s677_s1 + $0x8] sm:$0xff]  ;;  %554 = vset.pattern.permute.xlu0 %v556_v3  ;;  %555 = vset.pattern.permute.xlu1 %v556_v3  ;;  %v16_v4 = vld [vmem:[%s677_s1 + $0x10] sm:$0xff]  ;;  %vm558_vm3 = vmmov 0   ;;  %vm362_vm4 = vcmask 261120  }
   0x2   :  { %v14_v1 = vld [vmem:[%s677_s1] sm:$0xff]  ;;  %481 = vmatprep.subr.msk.mxu0 %vm96_vm0, %v22_v0  ;;  %v25_v6 = vld [vmem:[%s678_s2 + $0x10] sm:$0xff]  ;;  %v17_v7 = vld [vmem:[%s677_s1 + $0x18] sm:$0xff] }
   0x3   :  { %483 = vmatprep.mubr.msk.f32.mxu0 %vm71_vm1, %v14_v1  ;;  %482 = vmatpush3.msk.msra.mxu0 %vm96_vm0, %v22_v0  ;;  %v23_v5 = vld [vmem:[%s678_s2] sm:$0xff]  ;;  %v24_v9 = vld [vmem:[%s678_s2 + $0x8] sm:$0xff]  ;;  %v26_v10 = vld [vmem:[%s678_s2 + $0x18] sm:$0xff] }
   0x4   :  { %484 = vmatmul.mubr.msk.f32.vlgmr.msra.gmra.mrb[0].mxu0 %vm71_vm1, %v15_v2  ;;  %33 = vperm.xlu0 %554, %v23_v5   ;;  %v18_v8 = vld [vmem:[%s677_s1 + $0x20] sm:$0xff]  ;;  %v19_v11 = vld [vmem:[%s677_s1 + $0x28] sm:$0xff]  ;;  %v20_v12 = vld [vmem:[%s677_s1 + $0x30] sm:$0xff] }
   0x5   :  { %486 = vmatprep.mubr.msk.f32.mxu0 %vm71_vm1, %v16_v4  ;;  %43 = vperm.xlu1 %555, %v25_v6   ;;  %v27_v13 = vld [vmem:[%s678_s2 + $0x20] sm:$0xff]  ;;  %v28_v14 = vld [vmem:[%s678_s2 + $0x28] sm:$0xff]  ;;  %v21_v15 = vld [vmem:[%s677_s1 + $0x38] sm:$0xff] }
   0x6   :  { %v29_v16 = vld [vmem:[%s678_s2 + $0x30] sm:$0xff]  ;;  %v30_v17 = vld [vmem:[%s678_s2 + $0x38] sm:$0xff]  ;;  %v225_v18 = vld [vmem:[%s678_s2 + $0x40] sm:$0xff] }
   0x7   :  { %v226_v19 = vld [vmem:[%s678_s2 + $0x48] sm:$0xff]  ;;  %v227_v20 = vld [vmem:[%s678_s2 + $0x50] sm:$0xff]  ;;  %v228_v21 = vld [vmem:[%s678_s2 + $0x58] sm:$0xff] }
   0x8   :  { %487 = vmatmul.mubr.msk.f32.gmra.mrb[2].mxu0 %vm71_vm1, %v17_v7  ;;  %38 = vperm.xlu0 %554, %v24_v9   ;;  %v356_v22 = vld [vmem:[%s678_s2 + $0x60] sm:$0xff]  ;;  %v222_v4 = vld [vmem:[%s677_s1 + $0x48] sm:$0xff]  ;;  %v223_v5 = vld [vmem:[%s677_s1 + $0x50] sm:$0xff]  ;;  %v557_v7 = vmov 0.0|0.0  }
   0x9   :  { %489 = vmatprep.mubr.msk.f32.mxu0 %vm71_vm1, %v18_v8  ;;  %48 = vperm.xlu1 %555, %v26_v10   ;;  %v221_v23 = vld [vmem:[%s677_s1 + $0x40] sm:$0xff]  ;;  %v224_v6 = vld [vmem:[%s677_s1 + $0x58] sm:$0xff]  ;;  %v559_v8 = vmov 0.0  }
   0xa   :  { %511 = vmatprep.mubr.msk.f32.mxu1 %vm249_vm2, %v221_v23  ;;  %544 = vmatprep.subr.bf16.mxu0 %v557_v7 }
   0xc   :  { %490 = vmatmul.mubr.msk.f32.gmra.mrb[4].mxu0 %vm71_vm1, %v19_v11  ;;  %53 = vperm.xlu0 %554, %v27_v13  }
   0xd   :  { %492 = vmatprep.mubr.msk.f32.mxu0 %vm71_vm1, %v20_v12  ;;  %58 = vperm.xlu1 %555, %v28_v14  }
  0x10   :  { %493 = vmatmul.mubr.msk.f32.gmra.mrb[6].mxu0 %vm71_vm1, %v21_v15  ;;  %63 = vperm.xlu0 %554, %v29_v16  }
  0x11   :  { %68 = vperm.xlu1 %555, %v30_v17   ;;  %525 = vmatprep.mubr.msk.f32.mxu0 %vm558_vm3, %v559_v8 }
  0x14   :  { %231 = vperm.xlu0 %554, %v225_v18  }
  0x15   :  { %236 = vperm.xlu1 %555, %v226_v19  }
  0x18   :  { %241 = vperm.xlu0 %554, %v227_v20  }
  0x19   :  { %246 = vperm.xlu1 %555, %v228_v21  }
  0x1c   :  { %359 = vperm.xlu0 %554, %v356_v22  }
  0x83   :  { %v34_v24 = vpop.permute.xlu0 %33 }
  0x84   :  { %v44_v25 = vpop.permute.xlu1 %43 }
  0x87   :  { %v39_v26 = vpop.permute.xlu0 %38 }
  0x88   :  { %v49_v27 = vpop.permute.xlu1 %48 }
  0x8b   :  { %v54_v41 = vpop.permute.xlu0 %53 }
  0x8c   :  { %v59_v38 = vpop.permute.xlu1 %58 }
  0x8f   :  { %v64_v56 = vpop.permute.xlu0 %63 }
  0x90   :  { %v69_v52 = vpop.permute.xlu1 %68 }
  0x93   :  { %v232_v10 = vpop.permute.xlu0 %231 }
  0x94   :  { %v237_v9 = vpop.permute.xlu1 %236 }
  0x97   :  { %v242_v19 = vpop.permute.xlu0 %241 }
  0x98   :  { %v247_v16 = vpop.permute.xlu1 %246 }
  0xd7   :  { %v485_v28 = vpop.f32.mrb[0].mxu0 }
  0xd8   :  { %v172_v29 = vadd.f32 %v485_v28, %v39_v26  ;;  %v166_v30 = vpop.f32.mrb[1].mxu0 }
  0xd9   :  { %v167_v31 = vadd.f32 %v166_v30, %v34_v24 }
  0xda   :  { %v206_v32 = vmul.f32 0.1, %v172_v29 }
  0xdb   :  { %v205_v33 = vmul.f32 0.1, %v167_v31  ;;  %v488_v34 = vpop.f32.mrb[2].mxu0 }
  0xdc   :  { %v214_v35 = vmax.f32 %v172_v29, %v206_v32  ;;  %v182_v36 = vadd.f32 %v488_v34, %v49_v27  ;;  %v176_v37 = vpop.f32.mrb[3].mxu0  ;;  %v360_v32 = vpop.permute.xlu0 %359 }
  0xdd   :  { %v213_v39 = vmax.f32 %v167_v31, %v205_v33  ;;  %v177_v40 = vadd.f32 %v176_v37, %v44_v25  ;;  %v355_v31 = vld [vmem:[%s677_s1 + $0x60] sm:$0xff] }
  0xde   :  { %v208_v42 = vmul.f32 0.1, %v182_v36 }
  0xdf   :  { %v207_v43 = vmul.f32 0.1, %v177_v40  ;;  %v491_v44 = vpop.f32.mrb[4].mxu0  ;;  %v528_v45 = vpack.c.bf16 %v214_v35, %v213_v39 }
  0xe0   :  { %v216_v46 = vmax.f32 %v182_v36, %v208_v42  ;;  %v192_v47 = vadd.f32 %v491_v44, %v59_v38  ;;  %v186_v48 = vpop.f32.mrb[5].mxu0 }
  0xe1   :  { %v215_v49 = vmax.f32 %v177_v40, %v207_v43  ;;  %v187_v50 = vadd.f32 %v186_v48, %v54_v41  ;;  %529 = vmatprep.subr.bf16.mxu1 %v528_v45 }
  0xe2   :  { %v210_v51 = vmul.f32 0.1, %v192_v47  ;;  %531 = vmatpush3.bf16.msra.mxu1 %v528_v45 }
  0xe3   :  { %v209_v53 = vmul.f32 0.1, %v187_v50  ;;  %v494_v54 = vpop.f32.mrb[6].mxu0  ;;  %v532_v55 = vpack.c.bf16 %v216_v46, %v215_v49 }
  0xe4   :  { %v218_v57 = vmax.f32 %v192_v47, %v210_v51  ;;  %v202_v58 = vadd.f32 %v494_v54, %v69_v52  ;;  %v196_v59 = vpop.f32.mrb[7].mxu0 }
  0xe5   :  { %v217_v60 = vmax.f32 %v187_v50, %v209_v53  ;;  %v197_v61 = vadd.f32 %v196_v59, %v64_v56  ;;  %533 = vmatprep.subr.bf16.mxu1 %v532_v55 }
  0xe6   :  { %v212_v62 = vmul.f32 0.1, %v202_v58  ;;  %535 = vmatpush3.bf16.msra.mxu1 %v532_v55 }
  0xe7   :  { %v211_v63 = vmul.f32 0.1, %v197_v61  ;;  %v536_v0 = vpack.c.bf16 %v218_v57, %v217_v60 }
  0xe8   :  { %v220_v1 = vmax.f32 %v202_v58, %v212_v62 }
  0xe9   :  { %v219_v2 = vmax.f32 %v197_v61, %v211_v63  ;;  %537 = vmatprep.subr.bf16.mxu1 %v536_v0 }
  0xea   :  { %539 = vmatpush3.bf16.msra.mxu1 %v536_v0 }
  0xeb   :  { %v540_v3 = vpack.c.bf16 %v220_v1, %v219_v2 }
  0xed   :  { %541 = vmatprep.subr.bf16.mxu1 %v540_v3 }
  0xee   :  { %543 = vmatpush3.bf16.msra.mxu1 %v540_v3 }
  0xf1   :  { %512 = vmatmul.mubr.msk.f32.vlgmr.msra.gmra.mrb[0].mxu1 %vm249_vm2, %v222_v4 }
  0xf2   :  { %514 = vmatprep.mubr.msk.f32.mxu1 %vm249_vm2, %v223_v5 }
  0xf5   :  { %515 = vmatmul.mubr.msk.f32.gmra.mrb[2].mxu1 %vm249_vm2, %v224_v6 }
 0x1c4   :  { %v513_v11 = vpop.f32.mrb[0].mxu1 }
 0x1c5   :  { %v334_v12 = vadd.f32 %v513_v11, %v237_v9  ;;  %v328_v13 = vpop.f32.mrb[1].mxu1 }
 0x1c6   :  { %v329_v14 = vadd.f32 %v328_v13, %v232_v10 }
 0x1c7   :  { %v348_v15 = vmul.f32 0.1, %v334_v12 }
 0x1c8   :  { %v347_v17 = vmul.f32 0.1, %v329_v14  ;;  %v516_v18 = vpop.f32.mrb[2].mxu1 }
 0x1c9   :  { %v352_v20 = vmax.f32 %v334_v12, %v348_v15  ;;  %v344_v21 = vadd.f32 %v516_v18, %v247_v16  ;;  %v338_v22 = vpop.f32.mrb[3].mxu1 }
 0x1ca   :  { %v351_v23 = vmax.f32 %v329_v14, %v347_v17  ;;  %v339_v24 = vadd.f32 %v338_v22, %v242_v19 }
 0x1cb   :  { %v350_v25 = vmul.f32 0.1, %v344_v21 }
 0x1cc   :  { %v545_v26 = vpack.c.bf16 %v352_v20, %v351_v23  ;;  %v349_v27 = vmul.f32 0.1, %v339_v24 }
 0x1cd   :  { %v354_v28 = vmax.f32 %v344_v21, %v350_v25 }
 0x1ce   :  { %v353_v29 = vmax.f32 %v339_v24, %v349_v27  ;;  %546 = vmatpush3.bf16.msra.mxu0 %v545_v26 }
 0x1cf   :  { %547 = vmatprep.subr.bf16.mxu0 %v557_v7 }
 0x1d0   :  { %v548_v30 = vpack.c.bf16 %v354_v28, %v353_v29 }
 0x1d2   :  { %549 = vmatpush3.bf16.msra.mxu0 %v548_v30 }
 0x1d5   :  { %526 = vmatmul.mubr.msk.f32.vlgmr.msra.gmra.mrb[8].mxu0 %vm362_vm4, %v355_v31 }
 0x2a8   :  { %v432_v33 = vpop.f32.mrb[8].mxu0 }
 0x2a9   :  { %v433_v34 = vadd.f32 %v432_v33, %v360_v32  ;;  %v527_v35 = vpop.f32.mrb[9].mxu0 }
 0x2ab   :  { %436 = vst [vmem:[%s679_s3] sm:$0xff] %v433_v34 }

</bundles_post_ra>
